<compile_context>
chip_gen: v7x
topology: tpu7x:2x2x1
jax: 0.10.0
libtpu: 0.0.40
codegen_flags: <defaults>
</compile_context>

<pallas_src>
import jax
import jax.numpy as jnp
from jax import lax
from jax.experimental import pallas as pl
from jax.experimental.pallas import tpu as pltpu


def _round_up(x, m):
    return ((x + m - 1) // m) * m


def _linear_head_kernel(x_ref, w_ref, b_ref, o_ref):
    """o[1, TM] = (w . x^T)[row 0] + b.

    x_ref: (TM, H) streamed tile, w_ref: (8, H) resident (identical rows),
    b_ref: SMEM (1,), o_ref: (1, TM) lane-dense output block.
    """
    acc = lax.dot_general(
        w_ref[...], x_ref[...],
        dimension_numbers=(((1,), (1,)), ((), ())),   # contract over H (q @ k^T form)
        preferred_element_type=jnp.float32,
    )                                                  # (8, TM)
    o_ref[...] = (acc[0:1, :] + b_ref[0]).astype(o_ref.dtype)


def _linear_head(x2d, w_row, b):
    """x2d: [M, H], w_row: [1, H], b: [1]  ->  [M]."""
    M, H = x2d.shape
    bytes_per = jnp.dtype(x2d.dtype).itemsize

    # Row tile: multiple of 128 (keeps the lane-dense output block legal) and
    # <= ~4 MiB per buffer so the double-buffered input stays well inside the
    # scoped VMEM limit on v5e (16 MiB), v6e (32 MiB) and v7x (32 of 64 MiB).
    budget_per_buf = 4 * 1024 * 1024
    tm = (budget_per_buf // max(1, H * bytes_per)) // 128 * 128
    tm = max(128, min(1024, tm))
    tm = min(tm, _round_up(M, 128))
    m_pad = _round_up(M, tm)
    if m_pad != M:
        x2d = jnp.pad(x2d, ((0, m_pad - M), (0, 0)))

    # Replicate the single weight row to a full sublane tile (8 rows) so the
    # MXU operands are native-tile aligned; only row 0 of the result is stored.
    w8 = jnp.broadcast_to(w_row, (8, H))

    out = pl.pallas_call(
        _linear_head_kernel,
        out_shape=jax.ShapeDtypeStruct((1, m_pad), x2d.dtype),
        grid=(m_pad // tm,),
        in_specs=[
            pl.BlockSpec((tm, H), lambda i: (i, 0)),            # streamed row tiles
            pl.BlockSpec((8, H), lambda i: (0, 0)),             # resident weight rows
            pl.BlockSpec(memory_space=pltpu.MemorySpace.SMEM),  # scalar bias
        ],
        out_specs=pl.BlockSpec((1, tm), lambda i: (0, i)),      # lane-dense output
        compiler_params=pltpu.CompilerParams(
            dimension_semantics=("parallel",),                  # megacore on v7x
        ),
        cost_estimate=pl.CostEstimate(
            flops=2 * m_pad * H,
            transcendentals=0,
            bytes_accessed=bytes_per * (m_pad * H + 8 * H + m_pad) + 4,
        ),
    )(x2d, w8, b)
    return out[0, :M]


def alignment_prediction_head(sentence_output, doc_output, params):
    """Mirrors AlignmentPredictionHead.forward.

    sentence_output: (..., H) -> sent_pred_score: (..., 1)
    doc_output:      (..., H) -> alig_score:      (..., 1)
    """
    def apply(x, w, b):
        lead = x.shape[:-1]
        H = x.shape[-1]
        y = _linear_head(x.reshape(-1, H), w, b)   # (M,)
        return y.reshape(lead + (1,))

    sent_pred_score = apply(sentence_output, params["w_seq"], params["b_seq"])
    alig_score = apply(doc_output, params["w_alig"], params["b_alig"])
    return sent_pred_score, alig_score


def init_params(key, hidden_size):
    k1, k2, k3, k4 = jax.random.split(key, 4)
    bound = 1.0 / (hidden_size ** 0.5)  # torch.nn.Linear default init range
    # Weights are kept in PyTorch Linear layout: (out_features=1, in_features=H).
    w_seq = jax.random.uniform(k1, (1, hidden_size), jnp.float32, -bound, bound)
    b_seq = jax.random.uniform(k2, (1,), jnp.float32, -bound, bound)
    w_alig = jax.random.uniform(k3, (1, hidden_size), jnp.float32, -bound, bound)
    b_alig = jax.random.uniform(k4, (1,), jnp.float32, -bound, bound)
    return {"w_seq": w_seq, "b_seq": b_seq, "w_alig": w_alig, "b_alig": b_alig}


if __name__ == "__main__":
    hidden_size = 32
    batch, seq = 2, 8

    key = jax.random.PRNGKey(0)
    kp, ks, kd = jax.random.split(key, 3)
    params = init_params(kp, hidden_size)

    # sentence_output: per-token reps (B, S, H); doc_output: pooled (B, H).
    sentence_output = jax.random.normal(ks, (batch, seq, hidden_size), jnp.float32)
    doc_output = jax.random.normal(kd, (batch, hidden_size), jnp.float32)

    fwd = jax.jit(alignment_prediction_head)
    sent_pred_score, alig_score = fwd(sentence_output, doc_output, params)
    jax.block_until_ready((sent_pred_score, alig_score))

    # Correctness check against plain-JAX reference of the PyTorch forward.
    ref_sent = sentence_output @ params["w_seq"].T + params["b_seq"]
    ref_alig = doc_output @ params["w_alig"].T + params["b_alig"]
    assert sent_pred_score.shape == (batch, seq, 1)
    assert alig_score.shape == (batch, 1)
    assert jnp.allclose(sent_pred_score, ref_sent, atol=1e-5)
    assert jnp.allclose(alig_score, ref_alig, atol=1e-5)

    print("KERNEL_OK")
</pallas_src>

<mosaic_0001>
module attributes {stable_mosaic.version = 11 : i64} {
  func.func @_linear_head_kernel(%arg0: i32, %arg1: memref<128x32xf32, #tpu.memory_space<vmem>>, %arg2: memref<8x32xf32, #tpu.memory_space<vmem>>, %arg3: memref<1xf32, #tpu.memory_space<smem>>, %arg4: memref<1x128xf32, #tpu.memory_space<vmem>>) attributes {dimension_semantics = [#tpu.dimension_semantics<parallel>], iteration_bounds = array<i64: 1>, scalar_prefetch = 0 : i64, scratch_operands = 0 : i64, tpu.core_type = #tpu.core_type<tc>, window_params = [{transform_indices = @transform_0, window_bounds = array<i64: 128, 32>}, {pipeline_mode = #tpu.pipeline_mode<synchronous>, transform_indices = @transform_1, window_bounds = array<i64: 8, 32>}, {transform_indices = @transform_2, window_bounds = array<i64: 1>}, {transform_indices = @transform_3, window_bounds = array<i64: 1, 128>}]} {
    %c0 = arith.constant 0 : index
    %c0_0 = arith.constant 0 : index
    %0 = vector.load %arg2[%c0, %c0_0] : memref<8x32xf32, #tpu.memory_space<vmem>>, vector<8x32xf32>
    %c0_1 = arith.constant 0 : index
    %c0_2 = arith.constant 0 : index
    %1 = vector.load %arg1[%c0_1, %c0_2] : memref<128x32xf32, #tpu.memory_space<vmem>>, vector<128x32xf32>
    %cst = arith.constant dense<0.000000e+00> : vector<8x128xf32>
    %2 = tpu.matmul %0, %1, %cst {dimension_numbers = #tpu.dot_dimension_numbers<[1], [1], [0], [0], [0, 0, 1, 0], [], []>} : vector<8x32xf32>, vector<128x32xf32>, vector<8x128xf32> -> vector<8x128xf32>
    %3 = vector.extract_strided_slice %2 {offsets = [0, 0], sizes = [1, 128], strides = [1, 1]} : vector<8x128xf32> to vector<1x128xf32>
    %c0_3 = arith.constant 0 : index
    %4 = memref.load %arg3[%c0_3] : memref<1xf32, #tpu.memory_space<smem>>
    %5 = vector.broadcast %4 : f32 to vector<1x128xf32>
    %6 = arith.addf %3, %5 : vector<1x128xf32>
    %c0_4 = arith.constant 0 : index
    %c0_5 = arith.constant 0 : index
    %7 = vector.load %arg4[%c0_4, %c0_5] : memref<1x128xf32, #tpu.memory_space<vmem>>, vector<1x128xf32>
    tpu.vector_store %arg4[%c0_4, %c0_5], %6 {strides = array<i32>} : memref<1x128xf32, #tpu.memory_space<vmem>>, vector<1x128xf32>,
    return
  }
  func.func @transform_0(%arg0: i32) -> (i32, i32) {
    %c0_i32 = arith.constant 0 : i32
    %c0_i32_0 = arith.constant 0 : i32
    return %arg0, %c0_i32 : i32, i32
  }
  func.func @transform_1(%arg0: i32) -> (i32, i32) {
    %c0_i32 = arith.constant 0 : i32
    %c0_i32_0 = arith.constant 0 : i32
    %c0_i32_1 = arith.constant 0 : i32
    return %c0_i32, %c0_i32_0 : i32, i32
  }
  func.func @transform_2(%arg0: i32) -> i32 {
    %c0_i32 = arith.constant 0 : i32
    %c0_i32_0 = arith.constant 0 : i32
    return %c0_i32 : i32
  }
  func.func @transform_3(%arg0: i32) -> (i32, i32) {
    %c0_i32 = arith.constant 0 : i32
    %c0_i32_0 = arith.constant 0 : i32
    return %c0_i32, %arg0 : i32, i32
  }
}

</mosaic_0001>

<bundles_post_ra>
// kernel: squeeze.2
= control target key start
LH: loop header
LB: loop body
LE: loop exit
PB: predicated region body
PF: predicated region fallthrough
CT: control target
= control target key end

     0   :  { %s85_s0 = inlined_call_operand.vmem [shape: f32[16], index: 0, kind: input, shape index: {}]   ;;  %s86_s1 = inlined_call_operand.hbm [shape: f32[2,8,1], index: 1, kind: output, shape index: {}]  }
   0x1   :  { %v5_v0 = vld [vmem:[%s85_s0] sm:$0x1] }
   0x2   :  { %2 = vsyncpa [#allocation1], 0  ;;  %6 = vst [vmem:[#allocation3] sm:$0x1] %v5_v0  ;;  %vm8_vm0 = vcmask 64512   ;;  %s58_s0 = smov 120  }
   0x3   :  { %s59_s8 = smov [#allocation0]  }
   0x4   :  { %s26_s9 = sshll.u32 %s59_s8, 4  ;;  %s27_s9 = int_to_ptr.vmem [resolvable:$true] %s26_s9 }
   0x5   :  { %s34_s10 = scalar_lea.vmem %s27_s9, 32  ;;  %p39_p1 = scmp.lt.s32.totalorder %s27_s9, %s27_s9 }
   0x6   :  { %p35_p0 = scmp.ne.s32.totalorder %s27_s9, %s34_s10  ;;  %p40_p2 = scmp.lt.s32.totalorder %s34_s10, %s34_s10 }
   0x8   :  { %p41_p3 = por %p40_p2, %p39_p1 }
   0x9   :  { %v10_v1 = vld [vmem:[#allocation3] sm:$0x1]  }
   0xa   :  { %v7_v2 = vld [vmem:[#allocation3] sm:$0x1]   ;;  %11 = vrot.lane.b32.xlu0 %v10_v1, %s58_s0  ;;  %p42_p4 = pnand %p41_p3, %p35_p0 }
   0xb   :  { %9 = vst.msk [vmem:[#allocation2] sm:$0x1] %vm8_vm0, %v7_v2  }
  0x7c   :  { %v12_v3 = vpop.permute.xlu0 %11  }
  0x7d   :  { %15 = vst.msk [vmem:[#allocation2 + $0x1] sm:$0x1] %vm8_vm0, %v12_v3  }
  0x84   :  { %v19_v4 = vld [vmem:[#allocation2] sm:$0x3] }
  0x85   :  { %21 = vst [vmem:[#allocation0] sm:$0x3] %v19_v4 }
  0x86   :  { %45 = shalt.err (!%p42_p4)
}
  0x87   :  { %s46_s13 = scalar_lea.hbm %s86_s1, 32 }
  0x88   :  { %p47_p5 = scmp.ne.s32.totalorder %s86_s1, %s46_s13  ;;  %p50_p6 = scmp.lt.u32.totalorder %s46_s13, %s86_s1 }
  0x8a   :  { %p52_p7 = pnand %p50_p6, %p47_p5 }
  0x8c   :  { %55 = shalt.err (!%p52_p7)
}
  0x8d   :  { %29 = dma.vmem_to_hbm [thread:$0]  %s27_s9, 32, %s86_s1, [#allocation1]  }
  0x8e   :  { %56 = dma.done.wait [#allocation1], 32  }
  0x8f   :  { %57 = vsyncadd [#allocation1], 4294967264 }
  0x90   :  { %31 = vsyncpa [#allocation1], 1 }

// kernel: alignment_prediction_head.2
= control target key start
LH: loop header
LB: loop body
LE: loop exit
PB: predicated region body
PF: predicated region fallthrough
CT: control target
= control target key end

     0   :  { %vm32_vm0 = vcmask 261120   ;;  %v266_v0 = vmov 0.0|0.0   ;;  %vm267_vm2 = vmmov 0   ;;  %v268_v4 = vmov 0.0   ;;  %s369_s0 = inlined_call_operand.vmem [shape: f32[128,32], index: 0, kind: input, shape index: {}]   ;;  %s370_s1 = inlined_call_operand.vmem [shape: f32[8,32], index: 1, kind: input, shape index: {}]   ;;  %s371_s2 = inlined_call_operand.<no memory space> [shape: f32[1], index: 2, kind: input, shape index: {}]   ;;  %s372_s3 = inlined_call_operand.vmem [shape: f32[1,128], index: 3, kind: output, shape index: {}]  }
   0x1   :  { %231 = vmatprep.subr.bf16.mxu0 %v266_v0  ;;  %v16_v1 = vld [vmem:[%s369_s0] sm:$0xff]  ;;  %v17_v2 = vld [vmem:[%s369_s0 + $0x8] sm:$0xff]  ;;  %vm297_vm1 = vmpackc.low %vm32_vm0, %vm32_vm0  ;;  %228 = vmatprep.mubr.msk.f32.mxu0 %vm267_vm2, %v268_v4  ;;  %v155_v28 = vstv %s371_s2 }
   0x2   :  { %v232_v5 = vpack.c.bf16 %v17_v2, %v16_v1  ;;  %v18_v6 = vld [vmem:[%s369_s0 + $0x10] sm:$0xff]  ;;  %v19_v7 = vld [vmem:[%s369_s0 + $0x18] sm:$0xff]  ;;  %v20_v9 = vld [vmem:[%s369_s0 + $0x20] sm:$0xff] }
   0x3   :  { %v236_v8 = vpack.c.bf16 %v19_v7, %v18_v6  ;;  %v21_v10 = vld [vmem:[%s369_s0 + $0x28] sm:$0xff]  ;;  %v22_v12 = vld [vmem:[%s369_s0 + $0x30] sm:$0xff]  ;;  %v23_v13 = vld [vmem:[%s369_s0 + $0x38] sm:$0xff] }
   0x4   :  { %234 = vmatpush3.bf16.xpose.msk.msra.mxu0 %vm297_vm1, %v232_v5  ;;  %v240_v11 = vpack.c.bf16 %v21_v10, %v20_v9  ;;  %v244_v14 = vpack.c.bf16 %v23_v13, %v22_v12  ;;  %v24_v15 = vld [vmem:[%s369_s0 + $0x40] sm:$0xff]  ;;  %v25_v16 = vld [vmem:[%s369_s0 + $0x48] sm:$0xff]  ;;  %v26_v18 = vld [vmem:[%s369_s0 + $0x50] sm:$0xff] }
   0x5   :  { %235 = vmatprep.subr.bf16.mxu0 %v266_v0  ;;  %v248_v17 = vpack.c.bf16 %v25_v16, %v24_v15  ;;  %v27_v19 = vld [vmem:[%s369_s0 + $0x58] sm:$0xff]  ;;  %v28_v21 = vld [vmem:[%s369_s0 + $0x60] sm:$0xff]  ;;  %v29_v22 = vld [vmem:[%s369_s0 + $0x68] sm:$0xff] }
   0x6   :  { %v252_v20 = vpack.c.bf16 %v27_v19, %v26_v18  ;;  %v256_v23 = vpack.c.bf16 %v29_v22, %v28_v21  ;;  %v30_v24 = vld [vmem:[%s369_s0 + $0x70] sm:$0xff]  ;;  %v31_v25 = vld [vmem:[%s369_s0 + $0x78] sm:$0xff]  ;;  %v15_v27 = vld [vmem:[%s370_s1] sm:$0xff] }
   0x7   :  { %v260_v26 = vpack.c.bf16 %v31_v25, %v30_v24 }
   0xc   :  { %238 = vmatpush3.bf16.xpose.msk.msra.mxu0 %vm297_vm1, %v236_v8 }
   0xd   :  { %239 = vmatprep.subr.bf16.mxu0 %v266_v0 }
  0x14   :  { %242 = vmatpush3.bf16.xpose.msk.msra.mxu0 %vm297_vm1, %v240_v11 }
  0x15   :  { %243 = vmatprep.subr.bf16.mxu0 %v266_v0 }
  0x1c   :  { %246 = vmatpush3.bf16.xpose.msk.msra.mxu0 %vm297_vm1, %v244_v14 }
  0x1d   :  { %247 = vmatprep.subr.bf16.mxu0 %v266_v0 }
  0x24   :  { %250 = vmatpush3.bf16.xpose.msk.msra.mxu0 %vm297_vm1, %v248_v17 }
  0x25   :  { %251 = vmatprep.subr.bf16.mxu0 %v266_v0 }
  0x2c   :  { %254 = vmatpush3.bf16.xpose.msk.msra.mxu0 %vm297_vm1, %v252_v20 }
  0x2d   :  { %255 = vmatprep.subr.bf16.mxu0 %v266_v0 }
  0x34   :  { %258 = vmatpush3.bf16.xpose.msk.msra.mxu0 %vm297_vm1, %v256_v23 }
  0x35   :  { %259 = vmatprep.subr.bf16.mxu0 %v266_v0 }
  0x3c   :  { %262 = vmatpush3.bf16.xpose.msk.msra.mxu0 %vm297_vm1, %v260_v26 }
  0x43   :  { %229 = vmatmul.mubr.msk.f32.vlgmr.msra.gmra.mrb[0].mxu0 %vm32_vm0, %v15_v27 }
 0x116   :  { %v150_v29 = vpop.f32.mrb[0].mxu0 }
 0x117   :  { %v156_v30 = vadd.f32 %v155_v28, %v150_v29  ;;  %v230_v31 = vpop.f32.mrb[1].mxu0 }
 0x119   :  { %157 = vst [vmem:[%s372_s3] sm:$0x1] %v156_v30 }

</bundles_post_ra>
